<compile_context>
chip_gen: v5e
topology: v5e:2x2
jax: 0.10.0
libtpu: 0.0.40
codegen_flags: <defaults>
</compile_context>

<pallas_src>
import math

import jax
import jax.numpy as jnp
import numpy as np
from jax import lax
from jax.experimental import pallas as pl
from jax.experimental.pallas import tpu as pltpu


# ----------------------------------------------------------------------------
# In-kernel helpers
# ----------------------------------------------------------------------------
def _recip(x):
    """EUP approximate reciprocal + one Newton step (near f32-exact, off the VALU)."""
    r = pl.reciprocal(x, approx=True)
    return r * (2.0 - x * r)


# ----------------------------------------------------------------------------
# Kernels
# ----------------------------------------------------------------------------
def _norm_attention_kernel(q_ref, k_ref, v_ref, o_ref):
    q = q_ref[...]
    k = k_ref[...]
    v = v_ref[...]
    scale = 1.0 / math.sqrt(q.shape[-1])
    s = jnp.einsum("bld,bmd->blm", q, k, preferred_element_type=jnp.float32) * scale
    s = s - jnp.max(s, axis=-1, keepdims=True)
    e = jnp.exp(s)
    p = e * _recip(jnp.sum(e, axis=-1, keepdims=True))
    o_ref[...] = jnp.einsum(
        "blm,bmd->bld", p.astype(v.dtype), v, preferred_element_type=jnp.float32
    ).astype(o_ref.dtype)


def _make_rank_attention_kernel(L, D, chunk_rows, trend):
    """season/trend kernel (one batch element per grid step):
    similarity score -> exact flat ranks -> -log weights -> row-normalise -> @ V."""
    n = L * L
    cb = chunk_rows * L            # comparator flat elements per inner chunk (whole rows)
    n_chunks = L // chunk_rows
    inv_n = 1.0 / float(n)

    def kernel(q_ref, k_ref, v_ref, o_ref, fcol_ref, w_ref):
        qf = q_ref[0].astype(jnp.float32)              # (L, D)
        kf = k_ref[0].astype(jnp.float32)
        ones_row = jnp.ones((1, D), jnp.float32)       # for row-oriented k reductions (MXU)

        if trend:
            qc = qf - jnp.mean(qf, axis=-1, keepdims=True)
            kc = kf - jnp.mean(kf, axis=-1, keepdims=True)
            # ||qc_i - kc_j||^2 = ||qc_i||^2 + ||kc_j||^2 - 2 <qc_i, kc_j>
            cross = lax.dot_general(qc, kc, (((1,), (1,)), ((), ())),
                                    preferred_element_type=jnp.float32)     # (L, L)
            q_sq = jnp.sum(qc * qc, axis=-1, keepdims=True)                 # (L, 1)
            k_sq_row = lax.dot_general(ones_row, kc * kc, (((1,), (1,)), ((), ())),
                                       preferred_element_type=jnp.float32)  # (1, L)
            score = q_sq + k_sq_row - 2.0 * cross
        else:
            score = lax.dot_general(qf, kf, (((1,), (1,)), ((), ())),
                                    preferred_element_type=jnp.float32)     # (L, L)
            q_len = jnp.sqrt(jnp.sum(qf * qf, axis=-1, keepdims=True)) + 1e-5
            k_len_row = jnp.sqrt(
                lax.dot_general(ones_row, kf * kf, (((1,), (1,)), ((), ())),
                                preferred_element_type=jnp.float32)) + 1e-5  # (1, L)
            # exact division: these values feed rank comparisons
            score = score / (q_len * k_len_row)

        # Stage the score into the weight scratch (rows are rewritten in place below)
        # and build the row-major flat comparator column fcol[i*L + j] = score[i, j].
        w_ref[...] = score
        st = jnp.transpose(score)                                            # (L, L)
        # TODO(synk): replace the unrolled column copies with one (L,L)->(L*L,1) reshape
        # once Mosaic supports that relayout on this path.
        for i in range(L):
            fcol_ref[i * L:(i + 1) * L, :] = st[:, i:i + 1]

        # ---- exact descending rank, one score row per iteration ----
        # rank[i, j] = #{c : flat[c] > flat[i*L+j]} + #{c < i*L+j : flat[c] == flat[i*L+j]}
        def row_body(i, carry):
            t_row = w_ref[pl.ds(i, 1), :]                                    # (1, L) score row i
            t_idx = i * L + lax.broadcasted_iota(jnp.int32, (1, L), 1)       # (1, L)

            def partial_rank(c0, acc):
                comp = fcol_ref[pl.ds(c0, cb), :]                            # (cb, 1)
                c_idx = c0 + lax.broadcasted_iota(jnp.int32, (cb, 1), 0)     # (cb, 1)
                gt = comp > t_row                                            # (cb, L)
                tie = jnp.logical_and(comp == t_row, c_idx < t_idx)
                return acc + jnp.sum(jnp.logical_or(gt, tie).astype(jnp.float32),
                                     axis=0, keepdims=True)                  # (1, L)

            if n_chunks == 1:
                rank = partial_rank(0, jnp.zeros((1, L), jnp.float32))
            else:
                rank = lax.fori_loop(
                    0, n_chunks,
                    lambda c, acc: partial_rank(pl.multiple_of(c * cb, cb), acc),
                    jnp.zeros((1, L), jnp.float32))

            # -log weights written straight back as row i (no reconstruction pass).
            w_ref[pl.ds(i, 1), :] = -jnp.log((rank + 1.0) * inv_n)
            return carry

        lax.fori_loop(0, L, row_body, 0)

        # ---- row-normalise and apply to V ----
        w = w_ref[...]                                                       # (L, L)
        w = w * _recip(jnp.sum(w, axis=-1, keepdims=True))
        vb = v_ref[0]                                                        # (L, D)
        o_ref[0] = jnp.dot(w.astype(vb.dtype), vb,
                           preferred_element_type=jnp.float32).astype(o_ref.dtype)

    return kernel


# ----------------------------------------------------------------------------
# Sizing helpers (per-generation VMEM awareness)
# ----------------------------------------------------------------------------
def _vmem_capacity_bytes():
    try:
        cap = int(getattr(pltpu.get_tpu_info(), "vmem_capacity_bytes", 0))
        if cap > 0:
            return cap
    except Exception:
        pass
    return 64 << 20        # v7x per-TensorCore capacity: most conservative default


def _clamp_vmem_limit(est_bytes):
    # <= 3/4 of physical VMEM: ~48 MiB on v7x, ~96 MiB on v5e/v6e.
    hi = min(96 << 20, (_vmem_capacity_bytes() * 3) // 4)
    return int(max(32 << 20, min(hi, 2 * est_bytes)))


def _norm_vmem_estimate(Bt, L, D, itemsize):
    lane_d, lane_l = max(D, 128), max(L, 128)
    tiles = 2 * 4 * Bt * L * lane_d * itemsize          # double-buffered q/k/v/o blocks
    work = 3 * Bt * L * lane_l * 4                      # score / exp / prob transients
    return tiles + work + (1 << 20)


def _rank_vmem_estimate(L, D, chunk_rows, itemsize):
    n, lane_d, lane_l = L * L, max(D, 128), max(L, 128)
    tiles = 2 * 4 * L * lane_d * itemsize
    fcol = n * 128 * 4                                  # (n, 1) comparator column (lane-padded)
    wmat = max(L, 8) * lane_l * 4
    cmp = 4 * chunk_rows * L * lane_l * 4               # gt / tie / or / cast transients
    misc = 2 * max(L, 8) * lane_l * 4                   # score / transpose staging
    return tiles + fcol + wmat + cmp + misc + (2 << 20)


def _pick_block_batch(B, L, D, itemsize):
    """norm-mode batch tile: fill ~16 MiB of double-buffered tiles per grid step while
    keeping >= 2 (preferably even) grid steps for pipelining / v7x 2-TC split."""
    per_b = 2 * 4 * L * max(D, 128) * itemsize + 3 * L * max(L, 128) * 4
    cap = max(1, min(B, (16 << 20) // max(1, per_b)))
    if B >= 2:
        cap = max(1, min(cap, B // 2))
    divs = [d for d in range(1, cap + 1) if B % d == 0]
    even = [d for d in divs if (B // d) % 2 == 0]
    return max(even) if even else max(divs)


def _pick_chunk_rows(L, budget_bytes=2 << 20):
    """comparator chunk (in whole score rows) so each (cb, L) compare tile stays small."""
    m = max(1, min(L, budget_bytes // max(1, 4 * L * L)))
    while L % m:
        m -= 1
    return m


# ----------------------------------------------------------------------------
# Wrapper
# ----------------------------------------------------------------------------
def attention(query, key, value, mode="norm"):
    B, L, D = query.shape
    assert key.shape == (B, L, D) and value.shape == (B, L, D)
    itemsize = jnp.dtype(query.dtype).itemsize
    rank_mode = mode in ("season", "trend")

    if rank_mode:
        chunk_rows = _pick_chunk_rows(L)
        kernel = _make_rank_attention_kernel(L, D, chunk_rows, trend=(mode == "trend"))
        block_b = 1                                            # batch is the grid axis
        scratch = [pltpu.VMEM((L * L, 1), jnp.float32),        # flat comparator column
                   pltpu.VMEM((L, L), jnp.float32)]            # score -> weights, in place
        vmem_limit = _clamp_vmem_limit(_rank_vmem_estimate(L, D, chunk_rows, itemsize))
    else:
        kernel = _norm_attention_kernel
        block_b = _pick_block_batch(B, L, D, itemsize)
        scratch = []
        vmem_limit = _clamp_vmem_limit(_norm_vmem_estimate(block_b, L, D, itemsize))

    spec = pl.BlockSpec((block_b, L, D), lambda b: (b, 0, 0))
    return pl.pallas_call(
        kernel,
        out_shape=jax.ShapeDtypeStruct((B, L, D), query.dtype),
        grid_spec=pltpu.PrefetchScalarGridSpec(
            num_scalar_prefetch=0,
            grid=(B // block_b,),
            in_specs=[spec, spec, spec],
            out_specs=spec,
            scratch_shapes=scratch,
        ),
        compiler_params=pltpu.CompilerParams(
            dimension_semantics=("parallel",),
            vmem_limit_bytes=vmem_limit,
        ),
    )(query, key, value)


class Attention:
    """JAX/Pallas port of model/attention.py::Attention (no learnable parameters)."""

    def __init__(self, mode):
        self.mode = mode

    def __call__(self, query, key, value):
        return attention(query, key, value, mode=self.mode)


# ----------------------------------------------------------------------------
# Pure-JAX references (for validation only)
# ----------------------------------------------------------------------------
def _rank_desc_ref(flat):
    nn = flat.shape[-1]
    gt = flat[:, :, None] > flat[:, None, :]
    idx = jnp.arange(nn)
    eq = (flat[:, :, None] == flat[:, None, :]) & (idx[:, None] < idx[None, :])
    return jnp.sum((gt | eq).astype(jnp.float32), axis=1)


def sim_to_weight_ref(sim):
    B, L, M = sim.shape
    flat = sim.reshape(B, L * M)
    rank = _rank_desc_ref(flat)
    prob = (rank + 1.0) / float(L * M)
    w = (-jnp.log(prob)).reshape(B, L, M)
    return w / jnp.sum(w, axis=-1, keepdims=True)


def norm_attention_ref(q, k, v):
    score = jnp.einsum("bld,bmd->blm", q, k) / math.sqrt(q.shape[-1])
    score = jax.nn.softmax(score, axis=-1)
    return jnp.einsum("blm,bmd->bld", score, v)


def season_attention_ref(q, k, v):
    score = jnp.einsum("bld,bmd->blm", q, k)
    q_len = jnp.sqrt(jnp.sum(q * q, axis=-1, keepdims=True)) + 1e-5
    k_len = jnp.sqrt(jnp.sum(k * k, axis=-1, keepdims=True)) + 1e-5
    score = score / (q_len * jnp.swapaxes(k_len, -1, -2))
    return jnp.einsum("blm,bmd->bld", sim_to_weight_ref(score), v)


def trend_attention_ref(q, k, v):
    qc = q - jnp.mean(q, axis=-1, keepdims=True)
    kc = k - jnp.mean(k, axis=-1, keepdims=True)
    cross = jnp.einsum("bld,bmd->blm", qc, kc)
    q_sq = jnp.sum(qc * qc, axis=-1, keepdims=True)
    k_sq = jnp.sum(kc * kc, axis=-1, keepdims=True)
    score = q_sq + jnp.swapaxes(k_sq, -1, -2) - 2.0 * cross
    return jnp.einsum("blm,bmd->bld", sim_to_weight_ref(score), v)


# ----------------------------------------------------------------------------
if __name__ == "__main__":
    B, L, D = 2, 8, 32
    key0 = jax.random.PRNGKey(0)
    kq, kk, kv = jax.random.split(key0, 3)
    q = jax.random.normal(kq, (B, L, D), dtype=jnp.float32)
    k = jax.random.normal(kk, (B, L, D), dtype=jnp.float32)
    v = jax.random.normal(kv, (B, L, D), dtype=jnp.float32)

    refs = {"norm": norm_attention_ref,
            "season": season_attention_ref,
            "trend": trend_attention_ref}

    for mode, ref_fn in refs.items():
        attn = Attention(mode)
        out = jax.block_until_ready(attn(q, k, v))
        ref = ref_fn(q, k, v)
        np.testing.assert_allclose(np.asarray(out), np.asarray(ref),
                                   rtol=2e-3, atol=2e-3)

    print("KERNEL_OK")
</pallas_src>

<mosaic_0001>
module attributes {stable_mosaic.version = 11 : i64} {
  func.func @_norm_attention_kernel(%arg0: i32, %arg1: memref<1x8x32xf32, #tpu.memory_space<vmem>>, %arg2: memref<1x8x32xf32, #tpu.memory_space<vmem>>, %arg3: memref<1x8x32xf32, #tpu.memory_space<vmem>>, %arg4: memref<1x8x32xf32, #tpu.memory_space<vmem>>) attributes {dimension_semantics = [#tpu.dimension_semantics<parallel>], iteration_bounds = array<i64: 2>, scalar_prefetch = 0 : i64, scratch_operands = 0 : i64, tpu.core_type = #tpu.core_type<tc>, window_params = [{transform_indices = @transform_0, window_bounds = array<i64: 1, 8, 32>}, {transform_indices = @transform_1, window_bounds = array<i64: 1, 8, 32>}, {transform_indices = @transform_2, window_bounds = array<i64: 1, 8, 32>}, {transform_indices = @transform_3, window_bounds = array<i64: 1, 8, 32>}]} {
    %c0 = arith.constant 0 : index
    %c0_0 = arith.constant 0 : index
    %c0_1 = arith.constant 0 : index
    %0 = vector.load %arg1[%c0, %c0_0, %c0_1] : memref<1x8x32xf32, #tpu.memory_space<vmem>>, vector<1x8x32xf32>
    %c0_2 = arith.constant 0 : index
    %c0_3 = arith.constant 0 : index
    %c0_4 = arith.constant 0 : index
    %1 = vector.load %arg2[%c0_2, %c0_3, %c0_4] : memref<1x8x32xf32, #tpu.memory_space<vmem>>, vector<1x8x32xf32>
    %c0_5 = arith.constant 0 : index
    %c0_6 = arith.constant 0 : index
    %c0_7 = arith.constant 0 : index
    %2 = vector.load %arg3[%c0_5, %c0_6, %c0_7] : memref<1x8x32xf32, #tpu.memory_space<vmem>>, vector<1x8x32xf32>
    "tpu.trace_start"() <{level = 10 : i32, message = "bld,bmd->blm"}> : () -> ()
    %cst = arith.constant dense<0.000000e+00> : vector<1x8x8xf32>
    %3 = tpu.matmul %0, %1, %cst {dimension_numbers = #tpu.dot_dimension_numbers<[2], [2], [1], [1], [0, 0, 0, 1, 1, 1], [0], [0]>} : vector<1x8x32xf32>, vector<1x8x32xf32>, vector<1x8x8xf32> -> vector<1x8x8xf32>
    "tpu.trace_stop"() : () -> ()
    %cst_8 = arith.constant 0.176776692 : f32
    %4 = vector.broadcast %cst_8 : f32 to vector<1x8x8xf32>
    %5 = arith.mulf %3, %4 : vector<1x8x8xf32>
    %cst_9 = arith.constant dense<0xFF800000> : vector<1x8xf32>
    %6 = vector.multi_reduction <maximumf>, %5, %cst_9 [2] : vector<1x8x8xf32> to vector<1x8xf32>
    %7 = vector.shape_cast %6 : vector<1x8xf32> to vector<1x8x1xf32>
    %8 = vector.broadcast %7 : vector<1x8x1xf32> to vector<1x8x8xf32>
    %9 = arith.subf %5, %8 : vector<1x8x8xf32>
    %10 = math.exp %9 : vector<1x8x8xf32>
    %cst_10 = arith.constant dense<0.000000e+00> : vector<1x8xf32>
    %11 = vector.multi_reduction <add>, %10, %cst_10 [2] : vector<1x8x8xf32> to vector<1x8xf32>
    %12 = vector.shape_cast %11 : vector<1x8xf32> to vector<1x8x1xf32>
    %13 = tpu.reciprocal %12 {approx = true} : vector<1x8x1xf32> -> vector<1x8x1xf32>
    %14 = arith.mulf %12, %13 : vector<1x8x1xf32>
    %cst_11 = arith.constant 2.000000e+00 : f32
    %15 = vector.broadcast %cst_11 : f32 to vector<1x8x1xf32>
    %16 = arith.subf %15, %14 : vector<1x8x1xf32>
    %17 = arith.mulf %13, %16 : vector<1x8x1xf32>
    %18 = vector.broadcast %17 : vector<1x8x1xf32> to vector<1x8x8xf32>
    %19 = arith.mulf %10, %18 : vector<1x8x8xf32>
    "tpu.trace_start"() <{level = 10 : i32, message = "blm,bmd->bld"}> : () -> ()
    %cst_12 = arith.constant dense<0.000000e+00> : vector<1x8x32xf32>
    %20 = tpu.matmul %19, %2, %cst_12 {dimension_numbers = #tpu.dot_dimension_numbers<[2], [1], [1], [2], [0, 0, 0, 1, 1, 2], [0], [0]>} : vector<1x8x8xf32>, vector<1x8x32xf32>, vector<1x8x32xf32> -> vector<1x8x32xf32>
    "tpu.trace_stop"() : () -> ()
    %c0_13 = arith.constant 0 : index
    %c0_14 = arith.constant 0 : index
    %c0_15 = arith.constant 0 : index
    %21 = vector.load %arg4[%c0_13, %c0_14, %c0_15] : memref<1x8x32xf32, #tpu.memory_space<vmem>>, vector<1x8x32xf32>
    tpu.vector_store %arg4[%c0_13, %c0_14, %c0_15], %20 {strides = array<i32>} : memref<1x8x32xf32, #tpu.memory_space<vmem>>, vector<1x8x32xf32>,
    return
  }
  func.func @transform_0(%arg0: i32) -> (i32, i32, i32) {
    %c0_i32 = arith.constant 0 : i32
    %c0_i32_0 = arith.constant 0 : i32
    %c0_i32_1 = arith.constant 0 : i32
    return %arg0, %c0_i32, %c0_i32_0 : i32, i32, i32
  }
  func.func @transform_1(%arg0: i32) -> (i32, i32, i32) {
    %c0_i32 = arith.constant 0 : i32
    %c0_i32_0 = arith.constant 0 : i32
    %c0_i32_1 = arith.constant 0 : i32
    return %arg0, %c0_i32, %c0_i32_0 : i32, i32, i32
  }
  func.func @transform_2(%arg0: i32) -> (i32, i32, i32) {
    %c0_i32 = arith.constant 0 : i32
    %c0_i32_0 = arith.constant 0 : i32
    %c0_i32_1 = arith.constant 0 : i32
    return %arg0, %c0_i32, %c0_i32_0 : i32, i32, i32
  }
  func.func @transform_3(%arg0: i32) -> (i32, i32, i32) {
    %c0_i32 = arith.constant 0 : i32
    %c0_i32_0 = arith.constant 0 : i32
    %c0_i32_1 = arith.constant 0 : i32
    return %arg0, %c0_i32, %c0_i32_0 : i32, i32, i32
  }
}

</mosaic_0001>

<bundles_post_ra>
// kernel: tpu_custom_call.1
= control target key start
LH: loop header
LB: loop body
LE: loop exit
PB: predicated region body
PF: predicated region fallthrough
CT: control target
= control target key end

     0   :  { %s917_s0 = inlined_call_operand.hbm [shape: f32[2,8,32], index: 0, kind: input, shape index: {}]   ;;  %s918_s1 = inlined_call_operand.hbm [shape: f32[2,8,32], index: 1, kind: input, shape index: {}]   ;;  %s919_s2 = inlined_call_operand.hbm [shape: f32[2,8,32], index: 2, kind: input, shape index: {}]   ;;  %s920_s3 = inlined_call_operand.hbm [shape: f32[2,8,32], index: 3, kind: output, shape index: {}]  }
   0x1   :  { %921 = sst [smem:[#allocation13_spill]] %s918_s1 }
   0x2   :  { %8 = vsyncpa [#allocation3], 0 }
   0x3   :  { %10 = vsyncpa [#allocation3 + $0x1], 0 }
   0x4   :  { %11 = vsyncpa [#allocation6], 0 }
   0x5   :  { %13 = vsyncpa [#allocation6 + $0x1], 0 }
   0x6   :  { %14 = vsyncpa [#allocation4], 0 }
   0x7   :  { %16 = vsyncpa [#allocation4 + $0x1], 0  ;;  %s725_s12 = smov 0   ;;  %s727_s13 = smov 0  }
   0x8   :  { %s729_s14 = smov 0   ;;  %s731_s15 = smov 0  }
   0x9 LB: > { %s746_s16 = sadd.s32 4294967295, %s703_s15   ;;  %s462_s17 = sadd.s32 4294967294, %s703_s15   ;;  %s703_s15 = sphi %s731_s15, %s933_s15   ;;  %s699_s14 = sphi %s729_s14, %s932_s14   ;;  %s695_s13 = sphi %s727_s13, %s931_s13   ;;  %s691_s12 = sphi %s725_s12, %s930_s12  }
   0xa   : > { %s750_s18 = sadd.s32 1, %s703_s15   ;;  %s29_s19 = sadd.s32 1, %s699_s14 }
   0xb   : > { %s26_s20 = ssub.s32 %s703_s15, %s750_s18  ;;  %p36_p0 = scmp.ne.s32.totalorder %s699_s14, %s695_s13 }
   0xc   : > { %p27_p1 = scmp.eq.s32.totalorder %s26_s20, 0  ;;  %p37_p2 = scmp.eq.s32.totalorder %s703_s15, 0 }
   0xd   : > { %p42_p3 = scmp.ne.s32.totalorder %s695_s13, %s691_s12  ;;  %p43_p4 = scmp.eq.s32.totalorder %s746_s16, 0 }
   0xe   : > { %s762_s21 = scalar_select %p27_p1, %s699_s14, %s29_s19  }
   0xf   : > { %p38_p5 = por %p37_p2, %p36_p0  ;;  %p764_p6 = por %p43_p4, %p42_p3 }
  0x10   : > { %922 = sst [smem:[#allocation12_spill]] %s762_s21  ;;  %p118_p7 = scmp.eq.s32.totalorder %s746_s16, 1 }
  0x11   : > { %p124_p8 = scmp.eq.s32.totalorder %s462_s17, 1  ;;  %p464_p9 = scmp.ge.s32.totalorder %s703_s15, 2 }
  0x12   : > { %p505_p10 = scmp.lt.s32.totalorder %s703_s15, 2  ;;  %p771_p11 = por %p118_p7, %p36_p0 }
  0x13   : > { %p775_p12 = por %p124_p8, %p42_p3  ;;  %s144_s25 = sand.u32 1, %s699_s14  }
  0x14   : > { %s781_s26 = sshll.u32 %s703_s15, 3  ;;  %s785_s27 = sshll.u32 %s144_s25, 3 }
  0x15   : > { %p787_p13 = pnand %p505_p10, %p38_p5  ;;  %s163_s29 = sand.u32 1, %s703_s15  }
  0x16   : > { %s927_s1 = sld [smem:[#allocation13_spill]]  ;;  %s167_s6 = scalar_lea.vmem [#allocation5], %s785_s27 }
  0x17   : > { %s175_s7 = sshll.u32 %s167_s6, 4  ;;  %p471_p0 = scmp.ge.s32.totalorder %s703_s15, 1  ;;  %s176_s7 = int_to_ptr.vmem [resolvable:$true] %s175_s7 }
  0x18   : > { %s798_s9 = scalar_lea.sflag [#allocation6], %s163_s29  ;;  %p547_p2 = pneg %p787_p13 }
  0x1c   : > { %s171_s5 = scalar_lea.hbm %s927_s1, %s781_s26  ;;  %s550_s20 = scalar_lea.hbm %s927_s1, 16 }
  0x1d   : > { %s173_s8 = sshll.u32 %s171_s5, 4  ;;  %s174_s8 = int_to_ptr.hbm [resolvable:$true] %s173_s8 }
  0x1e   : > { %s543_s10 = sshra.s32 %s174_s8, 4  ;;  %s544_s10 = int_to_ptr.hbm [resolvable:$true] %s543_s10 }
  0x1f   : > { %s545_s11 = scalar_lea.hbm %s544_s10, 8  ;;  %p551_p5 = scmp.lt.s32.totalorder %s544_s10, %s927_s1 }
  0x20   : > { %p546_p1 = scmp.ne.s32.totalorder %s544_s10, %s545_s11  ;;  %p552_p7 = scmp.lt.s32.totalorder %s550_s20, %s545_s11 }
  0x22   : > { %p548_p3 = pnand %p547_p2, %p546_p1  ;;  %p553_p8 = por %p552_p7, %p551_p5 }
  0x24   : > { %p549_p4 = pneg %p548_p3 }
  0x26   : > { %p554_p10 = pnand %p553_p8, %p549_p4 }
  0x28   : > { %557 = shalt.err (!%p554_p10)
}
  0x29   : > { %497 = dma.hbm_to_vmem [thread:$0]  (!%p787_p13), %s174_s8, 128, %s176_s7, %s798_s9  }
  0x2a   : > { %p199_p1 = scmp.lt.s32.totalorder %s703_s15, 3  ;;  %s152_s6 = scalar_lea.hbm %s917_s0, %s781_s26 }
  0x2b   : > { %s154_s11 = sshll.u32 %s152_s6, 4  ;;  %s148_s17 = scalar_lea.vmem [#allocation2], %s785_s27  ;;  %s155_s11 = int_to_ptr.hbm [resolvable:$true] %s154_s11 }
  0x2c   : > { %p821_p3 = pnand %p471_p0, %p199_p1  ;;  %s156_s19 = sshll.u32 %s148_s17, 4  ;;  %s157_s19 = int_to_ptr.vmem [resolvable:$true] %s156_s19 }
  0x2d   : > { %s145_s20 = scalar_lea.sflag [#allocation3], %s144_s25  ;;  %s573_s30 = sshra.s32 %s155_s11, 4  ;;  %s574_s30 = int_to_ptr.hbm [resolvable:$true] %s573_s30 }
  0x2e   : > { %s575_s7 = scalar_lea.hbm %s574_s30, 8  ;;  %s580_s29 = scalar_lea.hbm %s917_s0, 16 }
  0x2f   : > { %p576_p4 = scmp.ne.s32.totalorder %s574_s30, %s575_s7  ;;  %p581_p0 = scmp.lt.s32.totalorder %s574_s30, %s917_s0 }
  0x30   : > { %p582_p8 = scmp.lt.s32.totalorder %s580_s29, %s575_s7 }
  0x31   : > { %p578_p5 = pnand %p576_p4, %p547_p2 }
  0x32   : > { %p583_p10 = por %p582_p8, %p581_p0 }
  0x33   : > { %p579_p7 = pneg %p578_p5 }
  0x35   : > { %p584_p1 = pnand %p583_p10, %p579_p7 }
  0x37   : > { %587 = shalt.err (!%p584_p1)
}
  0x38   : > { %494 = dma.hbm_to_vmem [thread:$0]  (!%p787_p13), %s155_s11, 128, %s157_s19, %s145_s20  }
  0x39   : > { %s190_s1 = scalar_lea.hbm %s919_s2, %s781_s26  ;;  %s186_s8 = scalar_lea.vmem [#allocation7], %s785_s27 }
  0x3a   : > { %s194_s4 = sshll.u32 %s186_s8, 4  ;;  %s192_s21 = sshll.u32 %s190_s1, 4  ;;  %s195_s4 = int_to_ptr.vmem [resolvable:$true] %s194_s4  ;;  %s193_s21 = int_to_ptr.hbm [resolvable:$true] %s192_s21 }
  0x3b   : > { %s603_s30 = sshra.s32 %s193_s21, 4  ;;  %s610_s11 = scalar_lea.hbm %s919_s2, 16  ;;  %s604_s30 = int_to_ptr.hbm [resolvable:$true] %s603_s30 }
  0x3c   : > { %s605_s7 = scalar_lea.hbm %s604_s30, 8  ;;  %p611_p0 = scmp.lt.s32.totalorder %s604_s30, %s919_s2 }
  0x3d   : > { %p606_p4 = scmp.ne.s32.totalorder %s604_s30, %s605_s7  ;;  %p612_p8 = scmp.lt.s32.totalorder %s610_s11, %s605_s7 }
  0x3f   : > { %p608_p5 = pnand %p606_p4, %p547_p2  ;;  %p613_p10 = por %p612_p8, %p611_p0 }
  0x41   : > { %p609_p7 = pneg %p608_p5 }
  0x43   : > { %p614_p1 = pnand %p613_p10, %p609_p7 }
  0x45   : > { %617 = shalt.err (!%p614_p1)
}
  0x46   : > { %500 = dma.hbm_to_vmem [thread:$0]  (!%p787_p13), %s193_s21, 128, %s195_s4, %s798_s9  }
  0x47   : > { %203 = sbr.rel (%p821_p3) target bundleno = 601 (0x259), region = 32  ;;  %s859_s1 = sand.u32 (!%p821_p3), 1, %s695_s13  }
  0x48   : > { %s862_s26 = sshll.u32 (!%p821_p3), %s859_s1, 3  ;;  %s206_s27 = scalar_lea.sflag (!%p821_p3), [#allocation3], %s859_s1 }
  0x49   : > { %s209_s6 = scalar_lea.vmem (!%p821_p3), [#allocation2], %s862_s26 }
  0x4c   : > { %678 = dma.done.wait (%p764_p6), %s206_s27, 128  }
  0x4d   : > { %680 = vsyncadd (%p764_p6), %s206_s27, 4294967168  ;;  %s215_s21 = sand.u32 1, %s746_s16   ;;  %s219_s9 = scalar_lea.vmem [#allocation5], %s862_s26 }
  0x4e   : > { %s216_s28 = scalar_lea.sflag [#allocation6], %s215_s21 }
  0x4f   : > { %682 = dma.done.wait (%p764_p6), %s216_s28, 256  }
  0x50   : > { %684 = vsyncadd (%p764_p6), %s216_s28, 4294967040  ;;  %vm266_vm0 = vcmask 261120   ;;  %v264_v0 = vld [vmem:[%s219_s9] sm:$0xff]  ;;  %v263_v1 = vld [vmem:[%s209_s6] sm:$0xff]  ;;  %vm294_vm1 = vcmask 64512   ;;  %s229_s22 = scalar_lea.vmem [#allocation7], %s862_s26 }
  0x51   : > { %476 = vmatpush.xpose.msk.msra.mxu0 %vm266_vm0, %v264_v0  ;;  %v265_v10 = vld [vmem:[%s229_s22] sm:$0xff]  ;;  %s480_s10 = sshll.u32 %s746_s16, 3  ;;  %s262_s4 = scalar_lea.vmem [#allocation8], %s862_s26 }
  0x52   : > { %327 = vmatpush.msra.mxu1 %v265_v10  ;;  %s344_s8 = scalar_lea.hbm %s920_s3, %s480_s10  ;;  %s346_s30 = sshll.u32 %s262_s4, 4  ;;  %s347_s30 = int_to_ptr.vmem [resolvable:$true] %s346_s30 }
  0x53   : > { %s348_s7 = sshll.u32 %s344_s8, 4  ;;  %s334_s29 = scalar_lea.sflag [#allocation4], %s859_s1  ;;  %s349_s7 = int_to_ptr.hbm [resolvable:$true] %s348_s7 }
  0x54   : > { %477 = vmatmul.msk.f32.vlgmr.msra.gmra.mxu0 %vm266_vm0, %v263_v1  ;;  %s647_s5 = sshra.s32 %s349_s7, 4  ;;  %s653_s20 = scalar_lea.hbm %s920_s3, 16  ;;  %s648_s5 = int_to_ptr.hbm [resolvable:$true] %s647_s5 }
  0x55   : > { %s649_s11 = scalar_lea.hbm %s648_s5, 8  ;;  %p654_p3 = scmp.lt.s32.totalorder %s648_s5, %s920_s3 }
  0x56   : > { %p650_p6 = scmp.ne.s32.totalorder %s648_s5, %s649_s11  ;;  %p655_p4 = scmp.lt.s32.totalorder %s653_s20, %s649_s11 }
  0x58   : > { %p651_p13 = pnand %p650_p6, %p771_p11  ;;  %p656_p5 = por %p655_p4, %p654_p3 }
  0x5a   : > { %p652_p2 = pneg %p651_p13 }
  0x5c   : > { %p657_p7 = pnand %p656_p5, %p652_p2 }
  0xd1   : > { %v290_v2 = vpop.f32.mrf.mxu0 }
  0xd2   : > { %v293_v3 = vmul.f32 0.17677669, %v290_v2 }
  0xd4   : > { %v295_v4 = vsel %vm294_vm1, %v293_v3, -inf }
  0xd5   : > { %296 = vmax.xlane.f32.xlu0 %v295_v4 }
 0x148   : > { %v297_v5 = vpop.xlane.xlu0 %296 }
 0x149   : > { %v298_v6 = vsub.f32 %v293_v3, %v297_v5 }
 0x14b   : > { %v299_v7 = vmul.f32 1.442695, %v298_v6 }
 0x14d   : > { %539 = vpow2.f32 %v299_v7 }
 0x153   : > { %v540_v8 = vpop.eup %539 }
 0x154   : > { %v301_v9 = vsel %vm294_vm1, %v540_v8, 0.0 }
 0x155   : > { %302 = vadd.xlane.f32.xlu0 %v301_v9 }
 0x1c8   : > { %v303_v11 = vpop.xlane.xlu0 %302 }
 0x1c9   : > { %541 = vrcp.f32 %v303_v11 }
 0x1cf   : > { %v542_v12 = vpop.eup %541 }
 0x1d0   : > { %v305_v13 = vmul.f32 %v542_v12, %v303_v11 }
 0x1d2   : > { %v306_v14 = vsub.f32 2.0, %v305_v13 }
 0x1d4   : > { %v307_v15 = vmul.f32 %v542_v12, %v306_v14 }
 0x1d6   : > { %v308_v16 = vmul.f32 %v540_v8, %v307_v15 }
 0x1d8   : > { %478 = vmatmul.msk.f32.vlgmr.msra.gmra.mxu1 %vm294_vm1, %v308_v16 }
 0x255   : > { %v329_v17 = vpop.f32.mrf.mxu1 }
 0x256   : > { %332 = vst.msk [vmem:[%s262_s4] sm:$0xff] %vm266_vm0, %v329_v17 }
 0x257   : > { %660 = shalt.err (!%p657_p7)
}
 0x258   : > { %489 = dma.vmem_to_hbm [thread:$0]  (%p771_p11), %s347_s30, 128, %s349_s7, %s334_s29  }
 0x259 PF: > { %s360_s1 = sand.u32 1, %s691_s12   ;;  %p502_p0 = pnand %p464_p9, %p775_p12 }
 0x25a   : > { %s361_s6 = scalar_lea.sflag [#allocation4], %s360_s1 }
 0x25b   : > { %p503_p8 = pneg %p502_p0 }
 0x25d   : > { %686 = dma.done.wait (%p503_p8), %s361_s6, 128  }
 0x25e   : > { %688 = vsyncadd (%p503_p8), %s361_s6, 4294967168  ;;  %s929_s21 = sld [smem:[#allocation12_spill]]  ;;  %p19_p10 = scmp.ge.s32.totalorder %s750_s18, 4  }
 0x25f   : > { %s930_s12 = smov %s695_s13  ;;  %s931_s13 = smov %s699_s14 }
 0x260   : > { %s933_s15 = smov %s750_s18  ;;  %21 = sbr.rel (!%p19_p10) target bundleno = 9 (0x9), region = 101 }
 0x264   : > { %s932_s14 = smov %s929_s21 }
 0x265   :  { %367 = vsyncpa [#allocation3], 1 }
 0x266   :  { %369 = vsyncpa [#allocation3 + $0x1], 1 }
 0x267   :  { %370 = vsyncpa [#allocation6], 1 }
 0x268   :  { %372 = vsyncpa [#allocation6 + $0x1], 1 }
 0x269   :  { %373 = vsyncpa [#allocation4], 1 }
 0x26a   :  { %375 = vsyncpa [#allocation4 + $0x1], 1 }

</bundles_post_ra>
